<compile_context>
chip_gen: v7x
topology: tpu7x:2x2x1
jax: 0.10.0
libtpu: 0.0.40
codegen_flags: <defaults>
</compile_context>

<pallas_src>
import math

import jax
import jax.numpy as jnp
from jax import lax
from jax.experimental import pallas as pl
from jax.experimental.pallas import tpu as pltpu

D_IN = 12
D_MODEL = 64
D_HID = 1024
D_OUT = 12
D_OUT_PAD = 128          # lane-dense output width (multiple of 128)
BN_EPS = 1e-5
LEAKY_SLOPE = 0.01
DEFAULT_TILE_B = 2048    # batch tile (bf16 weights/activations, f32 accum)


def _round_up(n, m):
    return ((n + m - 1) // m) * m


# ---------------------------------------------------------------------------
# Kernel: one batch tile per grid step.
#   z = x1 @ W_c + b_c          (folded heur_fc1 + fc1 + BN)
#   z = leaky_relu(z)
#   y = z @ W2_pad + b2_pad     (fc2, zero-padded to 128 output lanes)
# ---------------------------------------------------------------------------
def _fused_kernel(x1_ref, wc_ref, bc_ref, w2_ref, b2_ref, o_ref):
    # matmul 1 (bf16 x bf16 -> f32 accum), f32 bias add
    z = jnp.dot(x1_ref[...], wc_ref[...],
                preferred_element_type=jnp.float32) + bc_ref[...]
    # leaky_relu(0.01): slope < 1 so max(z, 0.01*z) is exact
    z = jnp.maximum(z, LEAKY_SLOPE * z)
    # dropout2 is identity in eval mode
    o_ref[...] = (jnp.dot(z.astype(w2_ref.dtype), w2_ref[...],
                          preferred_element_type=jnp.float32)
                  + b2_ref[...]).astype(o_ref.dtype)


# ---------------------------------------------------------------------------
# Parameter init (matches the PyTorch module's init scheme) and folding.
# ---------------------------------------------------------------------------
def _xavier_uniform(key, fan_in, fan_out):
    bound = math.sqrt(6.0 / (fan_in + fan_out))
    # stored as (in, out) == transpose of the PyTorch (out, in) weight
    return jax.random.uniform(key, (fan_in, fan_out), jnp.float32, -bound, bound)


def _linear_bias(key, fan_in, fan_out):
    bound = 1.0 / math.sqrt(fan_in)
    return jax.random.uniform(key, (1, fan_out), jnp.float32, -bound, bound)


def init_params(key):
    ks = jax.random.split(key, 6)
    return {
        "wh": _xavier_uniform(ks[0], D_IN, D_MODEL),
        "bh": _linear_bias(ks[1], D_IN, D_MODEL),
        "w1": _xavier_uniform(ks[2], D_MODEL, D_HID),
        "b1": _linear_bias(ks[3], D_MODEL, D_HID),
        # BatchNorm1d(1024) defaults: gamma=1, beta=0, running_mean=0, running_var=1
        "bn_g": jnp.ones((1, D_HID), jnp.float32),
        "bn_b": jnp.zeros((1, D_HID), jnp.float32),
        "bn_m": jnp.zeros((1, D_HID), jnp.float32),
        "bn_v": jnp.ones((1, D_HID), jnp.float32),
        "w2": _xavier_uniform(ks[4], D_HID, D_OUT),
        "b2": _linear_bias(ks[5], D_HID, D_OUT),
    }


def fold_params(params, weights_dtype=jnp.bfloat16):
    """Fold heur_fc1 + fc1 + BatchNorm(eval) into a single linear; pad fc2 to 128 lanes.

    Exact in infinite precision (eval-mode only).  weights_dtype=jnp.bfloat16 is
    the default (single-pass MXU, half the weight DMA bytes); pass jnp.float32
    for bit-tight numerics.  Biases stay f32 (added to the f32 accumulator).
    """
    s = params["bn_g"] * lax.rsqrt(params["bn_v"] + BN_EPS)               # (1, 1024)
    w_c = params["wh"] @ (params["w1"] * s)                                # (12, 1024)
    b_c = (params["bh"] @ params["w1"] + params["b1"]
           - params["bn_m"]) * s + params["bn_b"]                          # (1, 1024)
    w2p = jnp.zeros((D_HID, D_OUT_PAD), jnp.float32).at[:, :D_OUT].set(params["w2"])
    b2p = jnp.zeros((1, D_OUT_PAD), jnp.float32).at[:, :D_OUT].set(params["b2"])
    return {
        "w_c": w_c.astype(weights_dtype),
        "b_c": b_c.astype(jnp.float32),
        "w2": w2p.astype(weights_dtype),
        "b2": b2p.astype(jnp.float32),
    }


# ---------------------------------------------------------------------------
# Forward wrapper: batch-tiled grid, weights resident across steps.
# ---------------------------------------------------------------------------
def net_lsstack_only_forward(x, x1, folded, *, tile_b=DEFAULT_TILE_B):
    """x is accepted (matching the PyTorch signature) but unused."""
    del x  # overwritten inside the PyTorch forward; never contributes
    B = x1.shape[0]
    compute_dtype = folded["w_c"].dtype
    x1 = x1.astype(compute_dtype)          # cast once here, not per-tile in-kernel

    # Batch tile: multiple of 8; cap at ceil(B/2) so the grid has >=2 steps
    # when B > 8 and both v7x TensorCores get work under the "parallel" axis.
    tb = min(tile_b, max(8, _round_up(pl.cdiv(B, 2), 8)))
    grid = (pl.cdiv(B, tb),)               # ragged last block handled by Pallas

    out = pl.pallas_call(
        _fused_kernel,
        out_shape=jax.ShapeDtypeStruct((B, D_OUT_PAD), jnp.float32),
        grid=grid,
        in_specs=[
            pl.BlockSpec((tb, D_IN), lambda i: (i, 0)),            # x1 tile
            pl.BlockSpec((D_IN, D_HID), lambda i: (0, 0)),         # W_c (resident)
            pl.BlockSpec((1, D_HID), lambda i: (0, 0)),            # b_c (resident)
            pl.BlockSpec((D_HID, D_OUT_PAD), lambda i: (0, 0)),    # W2  (resident)
            pl.BlockSpec((1, D_OUT_PAD), lambda i: (0, 0)),        # b2  (resident)
        ],
        out_specs=pl.BlockSpec((tb, D_OUT_PAD), lambda i: (i, 0)),
        compiler_params=pltpu.CompilerParams(
            dimension_semantics=("parallel",),                     # megacore split on v7x
            vmem_limit_bytes=48 * 1024 * 1024),
    )(x1, folded["w_c"], folded["b_c"], folded["w2"], folded["b2"])

    # Lane-dense 128-wide kernel output; slice back to the module's 12 columns.
    # (A fused consumer could take the padded array and skip this extra pass.)
    return out[:, :D_OUT]


# ---------------------------------------------------------------------------
# Pure-JAX reference (unfused, exactly mirrors the PyTorch eval-mode forward).
# ---------------------------------------------------------------------------
def _reference_forward(x, x1, params):
    h = x1 @ params["wh"] + params["bh"]
    z = h @ params["w1"] + params["b1"]
    z = (z - params["bn_m"]) / jnp.sqrt(params["bn_v"] + BN_EPS) \
        * params["bn_g"] + params["bn_b"]
    z = jnp.where(z > 0, z, LEAKY_SLOPE * z)
    return z @ params["w2"] + params["b2"]


if __name__ == "__main__":
    key = jax.random.PRNGKey(0)
    k_param, k_x, k_x1, k_x1b = jax.random.split(key, 4)

    params = init_params(k_param)
    folded_bf16 = fold_params(params)                      # default bf16 weights
    folded_f32 = fold_params(params, weights_dtype=jnp.float32)

    # --- small check, bf16 path (B=8, single grid step) ---------------------
    B = 8
    x = jax.random.normal(k_x, (B, D_MODEL), jnp.float32)   # unused by forward
    x1 = jax.random.normal(k_x1, (B, D_IN), jnp.float32)    # heuristic features

    out = net_lsstack_only_forward(x, x1, folded_bf16)
    out = jax.block_until_ready(out)
    ref = _reference_forward(x, x1, params)
    assert out.shape == (B, D_OUT), out.shape
    assert jnp.allclose(out, ref, atol=3e-2, rtol=3e-2), \
        float(jnp.max(jnp.abs(out - ref)))

    # --- same inputs, f32 weights: validates fold + kernel math tightly ----
    out_f32 = jax.block_until_ready(net_lsstack_only_forward(x, x1, folded_f32))
    assert jnp.allclose(out_f32, ref, atol=2e-4, rtol=2e-4), \
        float(jnp.max(jnp.abs(out_f32 - ref)))

    # --- multi-tile check (grid > 1 and ragged last block, 20 = 8+8+4) -----
    B2 = 20
    x1b = jax.random.normal(k_x1b, (B2, D_IN), jnp.float32)
    out2 = net_lsstack_only_forward(None, x1b, folded_bf16, tile_b=8)  # grid=(3,)
    out2 = jax.block_until_ready(out2)
    ref2 = _reference_forward(None, x1b, params)
    assert out2.shape == (B2, D_OUT), out2.shape
    assert jnp.allclose(out2, ref2, atol=3e-2, rtol=3e-2), \
        float(jnp.max(jnp.abs(out2 - ref2)))

    print("KERNEL_OK")
</pallas_src>

<mosaic_0001>
module attributes {stable_mosaic.version = 11 : i64} {
  func.func @_fused_kernel(%arg0: i32, %arg1: memref<8x12xbf16, #tpu.memory_space<vmem>>, %arg2: memref<12x1024xbf16, #tpu.memory_space<vmem>>, %arg3: memref<1x1024xf32, #tpu.memory_space<vmem>>, %arg4: memref<1024x128xbf16, #tpu.memory_space<vmem>>, %arg5: memref<1x128xf32, #tpu.memory_space<vmem>>, %arg6: memref<8x128xf32, #tpu.memory_space<vmem>>) attributes {dimension_semantics = [#tpu.dimension_semantics<parallel>], iteration_bounds = array<i64: 1>, scalar_prefetch = 0 : i64, scratch_operands = 0 : i64, tpu.core_type = #tpu.core_type<tc>, window_params = [{transform_indices = @transform_0, window_bounds = array<i64: 8, 12>}, {pipeline_mode = #tpu.pipeline_mode<synchronous>, transform_indices = @transform_1, window_bounds = array<i64: 12, 1024>}, {pipeline_mode = #tpu.pipeline_mode<synchronous>, transform_indices = @transform_2, window_bounds = array<i64: 1, 1024>}, {pipeline_mode = #tpu.pipeline_mode<synchronous>, transform_indices = @transform_3, window_bounds = array<i64: 1024, 128>}, {pipeline_mode = #tpu.pipeline_mode<synchronous>, transform_indices = @transform_4, window_bounds = array<i64: 1, 128>}, {transform_indices = @transform_5, window_bounds = array<i64: 8, 128>}]} {
    %c0 = arith.constant 0 : index
    %c0_0 = arith.constant 0 : index
    %0 = vector.load %arg1[%c0, %c0_0] : memref<8x12xbf16, #tpu.memory_space<vmem>>, vector<8x12xbf16>
    %c0_1 = arith.constant 0 : index
    %c0_2 = arith.constant 0 : index
    %1 = vector.load %arg2[%c0_1, %c0_2] : memref<12x1024xbf16, #tpu.memory_space<vmem>>, vector<12x1024xbf16>
    %cst = arith.constant dense<0.000000e+00> : vector<8x1024xf32>
    %2 = tpu.matmul %0, %1, %cst {dimension_numbers = #tpu.dot_dimension_numbers<[1], [0], [0], [1], [0, 0, 1, 1], [], []>} : vector<8x12xbf16>, vector<12x1024xbf16>, vector<8x1024xf32> -> vector<8x1024xf32>
    %c0_3 = arith.constant 0 : index
    %c0_4 = arith.constant 0 : index
    %3 = vector.load %arg3[%c0_3, %c0_4] : memref<1x1024xf32, #tpu.memory_space<vmem>>, vector<1x1024xf32>
    %4 = vector.broadcast %3 : vector<1x1024xf32> to vector<8x1024xf32>
    %5 = arith.addf %2, %4 : vector<8x1024xf32>
    %cst_5 = arith.constant 0.00999999977 : f32
    %6 = vector.broadcast %cst_5 : f32 to vector<8x1024xf32>
    %7 = arith.mulf %6, %5 : vector<8x1024xf32>
    %8 = arith.maximumf %5, %7 : vector<8x1024xf32>
    %9 = arith.truncf %8 : vector<8x1024xf32> to vector<8x1024xbf16>
    %c0_6 = arith.constant 0 : index
    %c0_7 = arith.constant 0 : index
    %10 = vector.load %arg4[%c0_6, %c0_7] : memref<1024x128xbf16, #tpu.memory_space<vmem>>, vector<1024x128xbf16>
    %cst_8 = arith.constant dense<0.000000e+00> : vector<8x128xf32>
    %11 = tpu.matmul %9, %10, %cst_8 {dimension_numbers = #tpu.dot_dimension_numbers<[1], [0], [0], [1], [0, 0, 1, 1], [], []>} : vector<8x1024xbf16>, vector<1024x128xbf16>, vector<8x128xf32> -> vector<8x128xf32>
    %c0_9 = arith.constant 0 : index
    %c0_10 = arith.constant 0 : index
    %12 = vector.load %arg5[%c0_9, %c0_10] : memref<1x128xf32, #tpu.memory_space<vmem>>, vector<1x128xf32>
    %13 = vector.broadcast %12 : vector<1x128xf32> to vector<8x128xf32>
    %14 = arith.addf %11, %13 : vector<8x128xf32>
    %c0_11 = arith.constant 0 : index
    %c0_12 = arith.constant 0 : index
    %15 = vector.load %arg6[%c0_11, %c0_12] : memref<8x128xf32, #tpu.memory_space<vmem>>, vector<8x128xf32>
    tpu.vector_store %arg6[%c0_11, %c0_12], %14 {strides = array<i32>} : memref<8x128xf32, #tpu.memory_space<vmem>>, vector<8x128xf32>,
    return
  }
  func.func @transform_0(%arg0: i32) -> (i32, i32) {
    %c0_i32 = arith.constant 0 : i32
    %c0_i32_0 = arith.constant 0 : i32
    return %arg0, %c0_i32 : i32, i32
  }
  func.func @transform_1(%arg0: i32) -> (i32, i32) {
    %c0_i32 = arith.constant 0 : i32
    %c0_i32_0 = arith.constant 0 : i32
    %c0_i32_1 = arith.constant 0 : i32
    return %c0_i32, %c0_i32_0 : i32, i32
  }
  func.func @transform_2(%arg0: i32) -> (i32, i32) {
    %c0_i32 = arith.constant 0 : i32
    %c0_i32_0 = arith.constant 0 : i32
    %c0_i32_1 = arith.constant 0 : i32
    return %c0_i32, %c0_i32_0 : i32, i32
  }
  func.func @transform_3(%arg0: i32) -> (i32, i32) {
    %c0_i32 = arith.constant 0 : i32
    %c0_i32_0 = arith.constant 0 : i32
    %c0_i32_1 = arith.constant 0 : i32
    return %c0_i32, %c0_i32_0 : i32, i32
  }
  func.func @transform_4(%arg0: i32) -> (i32, i32) {
    %c0_i32 = arith.constant 0 : i32
    %c0_i32_0 = arith.constant 0 : i32
    %c0_i32_1 = arith.constant 0 : i32
    return %c0_i32, %c0_i32_0 : i32, i32
  }
  func.func @transform_5(%arg0: i32) -> (i32, i32) {
    %c0_i32 = arith.constant 0 : i32
    %c0_i32_0 = arith.constant 0 : i32
    return %arg0, %c0_i32 : i32, i32
  }
}

</mosaic_0001>

<bundles_post_ra>
// kernel: tpu_custom_call.1
= control target key start
LH: loop header
LB: loop body
LE: loop exit
PB: predicated region body
PF: predicated region fallthrough
CT: control target
= control target key end

     0   :  { %10 = vsyncpa [#allocation3], 0  ;;  %s1572_s0 = inlined_call_operand.hbm [shape: bf16[8,12], index: 0, kind: input, shape index: {}]   ;;  %s1573_s1 = inlined_call_operand.hbm [shape: bf16[12,1024], index: 1, kind: input, shape index: {}]   ;;  %s1574_s2 = inlined_call_operand.hbm [shape: f32[1,1024], index: 2, kind: input, shape index: {}]   ;;  %s1575_s3 = inlined_call_operand.hbm [shape: bf16[1024,128], index: 3, kind: input, shape index: {}]   ;;  %s1576_s4 = inlined_call_operand.vmem [shape: f32[1,128], index: 4, kind: input, shape index: {}]   ;;  %s1577_s5 = inlined_call_operand.hbm [shape: f32[8,128], index: 5, kind: output, shape index: {}]  }
   0x1   :  { %11 = vsyncpa [#allocation6], 0 }
   0x2   :  { %12 = vsyncpa [#allocation9], 0 }
   0x3   :  { %13 = vsyncpa [#allocation4], 0  ;;  %s1431_s18 = smov [#allocation5]   ;;  %s1313_s22 = scalar_lea.hbm %s1573_s1, 1024 }
   0x4   :  { %s29_s19 = sshll.u32 %s1431_s18, 4  ;;  %p1314_p0 = scmp.ne.s32.totalorder %s1573_s1, %s1313_s22  ;;  %s30_s19 = int_to_ptr.vmem [resolvable:$true] %s29_s19 }
   0x5   :  { %p1317_p1 = scmp.lt.u32.totalorder %s1313_s22, %s1573_s1 }
   0x7   :  { %p1319_p2 = pnand %p1317_p1, %p1314_p0 }
   0x9   :  { %1322 = shalt.err (!%p1319_p2)
}
   0xa   :  { %s1323_s27 = scalar_lea.vmem %s30_s19, 1024  ;;  %p1328_p4 = scmp.lt.s32.totalorder %s30_s19, %s30_s19 }
   0xb   :  { %p1324_p3 = scmp.ne.s32.totalorder %s30_s19, %s1323_s27  ;;  %p1329_p5 = scmp.lt.s32.totalorder %s1323_s27, %s1323_s27 }
   0xd   :  { %p1330_p6 = por %p1329_p5, %p1328_p4 }
   0xf   :  { %p1331_p7 = pnand %p1330_p6, %p1324_p3 }
  0x11   :  { %1334 = shalt.err (!%p1331_p7)
}
  0x12   :  { %s1432_s28 = smov 512   ;;  %s1433_s29 = smov 32  }
  0x13   :  { %35 = dma.hbm_to_vmem [thread:$0]  %s1573_s1, 1024, %s30_s19, [#allocation6], %s1432_s28, %s1432_s28, %s1433_s29  }
  0x14   :  { %s1434_s7 = smov [#allocation2]   ;;  %s1435_s9 = smov [#allocation7]  }
  0x15   :  { %s20_s8 = sshll.u32 %s1434_s7, 4  ;;  %s42_s10 = sshll.u32 %s1435_s9, 4  ;;  %s21_s8 = int_to_ptr.vmem [resolvable:$true] %s20_s8  ;;  %s43_s10 = int_to_ptr.vmem [resolvable:$true] %s42_s10 }
  0x16   :  { %s1335_s13 = scalar_lea.hbm %s1572_s0, 64 }
  0x17   :  { %p1336_p8 = scmp.ne.s32.totalorder %s1572_s0, %s1335_s13  ;;  %p1339_p9 = scmp.lt.u32.totalorder %s1335_s13, %s1572_s0 }
  0x19   :  { %p1341_p10 = pnand %p1339_p9, %p1336_p8 }
  0x1b   :  { %1344 = shalt.err (!%p1341_p10)
}
  0x1c   :  { %s1345_s1 = scalar_lea.vmem %s21_s8, 64  ;;  %p1350_p12 = scmp.lt.s32.totalorder %s21_s8, %s21_s8 }
  0x1d   :  { %p1346_p11 = scmp.ne.s32.totalorder %s21_s8, %s1345_s1  ;;  %p1351_p13 = scmp.lt.s32.totalorder %s1345_s1, %s1345_s1 }
  0x1f   :  { %p1352_p0 = por %p1351_p13, %p1350_p12 }
  0x21   :  { %p1353_p1 = pnand %p1352_p0, %p1346_p11 }
  0x23   :  { %1356 = shalt.err (!%p1353_p1)
}
  0x24   :  { %23 = dma.hbm_to_vmem [thread:$0]  %s1572_s0, 64, %s21_s8, [#allocation3]  }
  0x25   :  { %s1357_s22 = scalar_lea.hbm %s1574_s2, 128 }
  0x26   :  { %p1358_p2 = scmp.ne.s32.totalorder %s1574_s2, %s1357_s22  ;;  %p1361_p3 = scmp.lt.u32.totalorder %s1357_s22, %s1574_s2 }
  0x28   :  { %p1363_p4 = pnand %p1361_p3, %p1358_p2 }
  0x2a   :  { %1366 = shalt.err (!%p1363_p4)
}
  0x2b   :  { %s1367_s27 = scalar_lea.vmem %s43_s10, 128  ;;  %p1372_p6 = scmp.lt.s32.totalorder %s43_s10, %s43_s10 }
  0x2c   :  { %p1368_p5 = scmp.ne.s32.totalorder %s43_s10, %s1367_s27  ;;  %p1373_p7 = scmp.lt.s32.totalorder %s1367_s27, %s1367_s27 }
  0x2e   :  { %p1374_p8 = por %p1373_p7, %p1372_p6 }
  0x30   :  { %p1375_p9 = pnand %p1374_p8, %p1368_p5 }
  0x32   :  { %1378 = shalt.err (!%p1375_p9)
}
  0x33   :  { %45 = dma.hbm_to_vmem [thread:$0]  %s1574_s2, 128, %s43_s10, [#allocation6]  }
  0x34   :  { %s1436_s29 = smov [#allocation8]   ;;  %s1379_s8 = scalar_lea.hbm %s1575_s3, 8192 }
  0x35   :  { %s51_s30 = sshll.u32 %s1436_s29, 4  ;;  %p1380_p10 = scmp.ne.s32.totalorder %s1575_s3, %s1379_s8  ;;  %s52_s30 = int_to_ptr.vmem [resolvable:$true] %s51_s30 }
  0x36   :  { %p1383_p11 = scmp.lt.u32.totalorder %s1379_s8, %s1575_s3 }
  0x38   :  { %p1385_p12 = pnand %p1383_p11, %p1380_p10 }
  0x3a   :  { %1388 = shalt.err (!%p1385_p12)
}
  0x3b   :  { %s1389_s14 = scalar_lea.vmem %s52_s30, 8192  ;;  %p1394_p0 = scmp.lt.s32.totalorder %s52_s30, %s52_s30 }
  0x3c   :  { %p1390_p13 = scmp.ne.s32.totalorder %s52_s30, %s1389_s14  ;;  %p1395_p1 = scmp.lt.s32.totalorder %s1389_s14, %s1389_s14 }
  0x3e   :  { %p1396_p2 = por %p1395_p1, %p1394_p0 }
  0x40   :  { %p1397_p3 = pnand %p1396_p2, %p1390_p13 }
  0x42   :  { %1400 = shalt.err (!%p1397_p3)
}
  0x43   :  { %s1437_s2 = smov 64   ;;  %s1438_s10 = smov 4  }
  0x44   :  { %57 = dma.hbm_to_vmem [thread:$0]  %s1575_s3, 8192, %s52_s30, [#allocation9], %s1437_s2, %s1437_s2, %s1438_s10  }
  0x45   :  { %1423 = dma.done.wait [#allocation3], 64  }
  0x46   :  { %1424 = vsyncadd [#allocation3], 4294967232 }
  0x47   :  { %1425 = dma.done.wait [#allocation6], 1152  }
  0x48   :  { %1426 = vsyncadd [#allocation6], 4294966144 }
  0x49   :  { %1427 = dma.done.wait [#allocation9], 8192  }
  0x4a   :  { %1428 = vsyncadd [#allocation9], 4294959104  ;;  %v1439_v0 = vmov 0   ;;  %v74_v1 = vld [vmem:[#allocation5] sm:$0xff]  ;;  %vm160_vm0 = vcmask 1045504   ;;  %v75_v3 = vld [vmem:[#allocation5 + $0x8] sm:$0xff]  ;;  %v84_v56 = vlaneseq }
  0x4b   :  { %217 = vmatprep.mubr.bf16.mxu0 %v1439_v0  ;;  %258 = vmatprep.mubr.bf16.mxu1 %v1439_v0  ;;  %v78_v2 = vld [vmem:[#allocation5 + $0x20] sm:$0x33]  ;;  %v79_v5 = vld [vmem:[#allocation5 + $0x28] sm:$0x33]  ;;  %v76_v7 = vld [vmem:[#allocation5 + $0x10] sm:$0xff]  ;;  %vm156_vm1 = vcmask 97280  }
  0x4c   :  { %v1071_v4 = vcombine.high %v74_v1, %v78_v2  ;;  %v1070_v6 = vcombine.low %v74_v1, %v78_v2  ;;  %v1073_v8 = vcombine.high %v75_v3, %v79_v5  ;;  %v1072_v9 = vcombine.low %v75_v3, %v79_v5  ;;  %v73_v10 = vld [vmem:[#allocation2] sm:$0xf]  ;;  %v80_v11 = vld [vmem:[#allocation5 + $0x30] sm:$0x33]  ;;  %v1249_v22 = vld [vmem:[#allocation8 + $0x40] sm:$0xff]  }
  0x4d   :  { %v77_v12 = vld [vmem:[#allocation5 + $0x18] sm:$0xff]  ;;  %v1075_v15 = vcombine.high %v76_v7, %v80_v11  ;;  %v1074_v16 = vcombine.low %v76_v7, %v80_v11  ;;  %v1250_v23 = vld [vmem:[#allocation8 + $0xc0] sm:$0xff]   ;;  %v1253_v26 = vld [vmem:[#allocation8 + $0x48] sm:$0xff]   ;;  %v1531_v57 = vshrl.u32 %v84_v56, 7 }
  0x4e   :  { %v81_v13 = vld [vmem:[#allocation5 + $0x38] sm:$0x33]  ;;  %1078 = vmatprep.subr.msk.bf16.mxu0 %vm160_vm0, %v1071_v4  ;;  %v162_v14 = vsel %vm160_vm0, %v1070_v6, 0  ;;  %1080 = vmatprep.subr.msk.bf16.mxu1 %vm160_vm0, %v1073_v8  ;;  %v168_v18 = vsel %vm160_vm0, %v1072_v9, 0  ;;  %v1251_v24 = vld [vmem:[#allocation8] sm:$0xff]   ;;  %v1254_v27 = vld [vmem:[#allocation8 + $0xc8] sm:$0xff]  }
  0x4f   :  { %v1077_v17 = vcombine.high %v77_v12, %v81_v13  ;;  %186 = vmatpush1.bf16.msra.mxu0 %v162_v14  ;;  %v1076_v19 = vcombine.low %v77_v12, %v81_v13  ;;  %227 = vmatpush1.bf16.msra.mxu1 %v168_v18  ;;  %v174_v20 = vsel %vm160_vm0, %v1074_v16, 0  ;;  %v1252_v25 = vld [vmem:[#allocation8 + $0x80] sm:$0xff]   ;;  %v1255_v28 = vld [vmem:[#allocation8 + $0x8] sm:$0xff]   ;;  %v1257_v30 = vld [vmem:[#allocation8 + $0x50] sm:$0xff]   ;;  %v86_v58 = vsub.s32 0, %v1531_v57 }
  0x50   :  { %1082 = vmatprep.subr.msk.bf16.mxu0 %vm160_vm0, %v1075_v15  ;;  %v1256_v29 = vld [vmem:[#allocation8 + $0x88] sm:$0xff]   ;;  %v1258_v31 = vld [vmem:[#allocation8 + $0xd0] sm:$0xff]   ;;  %v1261_v34 = vld [vmem:[#allocation8 + $0x58] sm:$0xff]   ;;  %v94_v60 = vsub.s32 2, %v1531_v57  ;;  %v90_v61 = vsub.s32 1, %v1531_v57  ;;  %v98_v62 = vsub.s32 3, %v1531_v57 }
  0x51   :  { %1084 = vmatprep.subr.msk.bf16.mxu1 %vm160_vm0, %v1077_v17  ;;  %v180_v21 = vsel %vm160_vm0, %v1076_v19, 0  ;;  %v1259_v32 = vld [vmem:[#allocation8 + $0x10] sm:$0xff]   ;;  %v1262_v35 = vld [vmem:[#allocation8 + $0xd8] sm:$0xff]   ;;  %v1265_v38 = vld [vmem:[#allocation8 + $0x60] sm:$0xff]   ;;  %v106_v11 = vsub.s32 5, %v1531_v57  ;;  %v114_v16 = vsub.s32 7, %v1531_v57 }
  0x52   :  { %1079 = vmatmul.mubr.msk.bf16.vlgmr.msra.gmra.mrb[0].mxu0 %vm156_vm1, %v73_v10  ;;  %1081 = vmatmul.mubr.msk.bf16.vlgmr.msra.gmra.mrb[0].mxu1 %vm156_vm1, %v73_v10  ;;  %v1260_v33 = vld [vmem:[#allocation8 + $0x90] sm:$0xff]   ;;  %v1263_v36 = vld [vmem:[#allocation8 + $0x18] sm:$0xff]   ;;  %v1266_v39 = vld [vmem:[#allocation8 + $0xe0] sm:$0xff]  }
  0x53   :  { %268 = vmatpush1.bf16.msra.mxu0 %v174_v20  ;;  %309 = vmatpush1.bf16.msra.mxu1 %v180_v21  ;;  %v1264_v37 = vld [vmem:[#allocation8 + $0x98] sm:$0xff]   ;;  %v1267_v40 = vld [vmem:[#allocation8 + $0x20] sm:$0xff]   ;;  %v1269_v42 = vld [vmem:[#allocation8 + $0x68] sm:$0xff]  }
  0x54   :  { %299 = vmatprep.mubr.bf16.mxu0 %v1439_v0  ;;  %340 = vmatprep.mubr.bf16.mxu1 %v1439_v0  ;;  %v1268_v41 = vld [vmem:[#allocation8 + $0xa0] sm:$0xff]   ;;  %v1270_v43 = vld [vmem:[#allocation8 + $0xe8] sm:$0xff]   ;;  %v1273_v46 = vld [vmem:[#allocation8 + $0x70] sm:$0xff]  }
  0x55   :  { %1151 = vmatprep.subr.bf16.mxu0 %v1249_v22  ;;  %1173 = vmatprep.subr.bf16.mxu1 %v1250_v23  ;;  %v1271_v44 = vld [vmem:[#allocation8 + $0x28] sm:$0xff]   ;;  %v1274_v47 = vld [vmem:[#allocation8 + $0xf0] sm:$0xff]   ;;  %v1277_v50 = vld [vmem:[#allocation8 + $0x78] sm:$0xff]  }
  0x56   :  { %v1272_v45 = vld [vmem:[#allocation8 + $0xa8] sm:$0xff]   ;;  %v1275_v48 = vld [vmem:[#allocation8 + $0x30] sm:$0xff]   ;;  %v1278_v51 = vld [vmem:[#allocation8 + $0xf8] sm:$0xff]  }
  0x57   :  { %v1276_v49 = vld [vmem:[#allocation8 + $0xb0] sm:$0xff]   ;;  %v1279_v52 = vld [vmem:[#allocation8 + $0x38] sm:$0xff]   ;;  %v1281_v54 = vld [vmem:[#allocation8 + $0x140] sm:$0xff]  }
  0x58   :  { %v1280_v53 = vld [vmem:[#allocation8 + $0xb8] sm:$0xff]   ;;  %v1282_v55 = vld [vmem:[#allocation8 + $0x1c0] sm:$0xff]  }
  0x59   :  { %v1534_v59 = vld [vmem:[#allocation7] sm:$0xff] }
  0x5a   :  { %1083 = vmatmul.mubr.msk.bf16.vlgmr.msra.gmra.mrb[4].mxu0 %vm156_vm1, %v73_v10  ;;  %1085 = vmatmul.mubr.msk.bf16.vlgmr.msra.gmra.mrb[4].mxu1 %vm156_vm1, %v73_v10  ;;  %v87_v63 = vrot.slane %v1534_v59, %v86_v58  ;;  %v95_v0 = vrot.slane %v1534_v59, %v94_v60  ;;  %v91_v1 = vrot.slane %v1534_v59, %v90_v61  ;;  %v1293_v56 = vld [vmem:[#allocation8 + $0x158] sm:$0xff]  }
  0x5b   :  { %1152 = vmatpush3.bf16.msra.mxu0 %v1251_v24  ;;  %1174 = vmatpush3.bf16.msra.mxu1 %v1252_v25  ;;  %v99_v2 = vrot.slane %v1534_v59, %v98_v62  ;;  %v107_v24 = vrot.slane %v1534_v59, %v106_v11  ;;  %v1294_v60 = vld [vmem:[#allocation8 + $0x1d8] sm:$0xff]   ;;  %v1304_v11 = vld [vmem:[#allocation8 + $0x1a8] sm:$0xff]  }
  0x5c   :  { %1153 = vmatprep.subr.bf16.mxu0 %v1253_v26  ;;  %1175 = vmatprep.subr.bf16.mxu1 %v1254_v27  ;;  %v115_v26 = vrot.slane %v1534_v59, %v114_v16  ;;  %v1295_v61 = vld [vmem:[#allocation8 + $0x118] sm:$0xff]   ;;  %v1308_v16 = vld [vmem:[#allocation8 + $0x1b0] sm:$0xff]  }
  0x5d   :  { %v1296_v62 = vld [vmem:[#allocation8 + $0x198] sm:$0xff]  }
  0x5f   :  { %1154 = vmatpush3.bf16.msra.mxu0 %v1255_v28  ;;  %1176 = vmatpush3.bf16.msra.mxu1 %v1256_v29  ;;  %v1283_v28 = vld [vmem:[#allocation8 + $0x100] sm:$0xff]  }
  0x60   :  { %1155 = vmatprep.subr.bf16.mxu0 %v1257_v30  ;;  %1177 = vmatprep.subr.bf16.mxu1 %v1258_v31 }
  0x63   :  { %1156 = vmatpush3.bf16.msra.mxu0 %v1259_v32  ;;  %1178 = vmatpush3.bf16.msra.mxu1 %v1260_v33  ;;  %v1284_v32 = vld [vmem:[#allocation8 + $0x180] sm:$0xff]   ;;  %v1285_v33 = vld [vmem:[#allocation8 + $0x148] sm:$0xff]  }
  0x64   :  { %1157 = vmatprep.subr.bf16.mxu0 %v1261_v34  ;;  %1179 = vmatprep.subr.bf16.mxu1 %v1262_v35 }
  0x67   :  { %1158 = vmatpush3.bf16.msra.mxu0 %v1263_v36  ;;  %1180 = vmatpush3.bf16.msra.mxu1 %v1264_v37  ;;  %v1286_v37 = vld [vmem:[#allocation8 + $0x1c8] sm:$0xff]  }
  0x68   :  { %1159 = vmatprep.subr.bf16.mxu0 %v1265_v38  ;;  %1181 = vmatprep.subr.bf16.mxu1 %v1266_v39 }
  0x6b   :  { %1160 = vmatpush3.bf16.msra.mxu0 %v1267_v40  ;;  %1182 = vmatpush3.bf16.msra.mxu1 %v1268_v41 }
  0x6c   :  { %1161 = vmatprep.subr.bf16.mxu0 %v1269_v42  ;;  %1183 = vmatprep.subr.bf16.mxu1 %v1270_v43 }
  0x6f   :  { %1162 = vmatpush3.bf16.msra.mxu0 %v1271_v44  ;;  %1184 = vmatpush3.bf16.msra.mxu1 %v1272_v45  ;;  %v1287_v44 = vld [vmem:[#allocation8 + $0x108] sm:$0xff]  }
  0x70   :  { %1163 = vmatprep.subr.bf16.mxu0 %v1273_v46  ;;  %1185 = vmatprep.subr.bf16.mxu1 %v1274_v47  ;;  %v1288_v47 = vld [vmem:[#allocation8 + $0x188] sm:$0xff]  }
  0x73   :  { %1164 = vmatpush3.bf16.msra.mxu0 %v1275_v48  ;;  %1186 = vmatpush3.bf16.msra.mxu1 %v1276_v49  ;;  %v1289_v48 = vld [vmem:[#allocation8 + $0x150] sm:$0xff]  }
  0x74   :  { %1165 = vmatprep.subr.bf16.mxu0 %v1277_v50  ;;  %1187 = vmatprep.subr.bf16.mxu1 %v1278_v51  ;;  %v1290_v50 = vld [vmem:[#allocation8 + $0x1d0] sm:$0xff]  }
  0x77   :  { %1166 = vmatpush3.bf16.msra.mxu0 %v1279_v52  ;;  %1188 = vmatpush3.bf16.msra.mxu1 %v1280_v53  ;;  %v1291_v53 = vld [vmem:[#allocation8 + $0x110] sm:$0xff]  }
  0x78   :  { %1195 = vmatprep.subr.bf16.mxu0 %v1281_v54  ;;  %1217 = vmatprep.subr.bf16.mxu1 %v1282_v55  ;;  %v1292_v55 = vld [vmem:[#allocation8 + $0x190] sm:$0xff]  }
 0x125   :  { %v219_v3 = vpop.f32.mrb[0].mxu0  ;;  %v260_v5 = vpop.f32.mrb[0].mxu1 }
 0x126   :  { %v220_v4 = vadd.f32 %v219_v3, %v87_v63  ;;  %v221_v6 = vpop.f32.mrb[1].mxu0  ;;  %v261_v7 = vadd.f32 %v260_v5, %v95_v0  ;;  %v262_v9 = vpop.f32.mrb[1].mxu1  ;;  %v1297_v63 = vld [vmem:[#allocation8 + $0x160] sm:$0xff]   ;;  %v102_v0 = vsub.s32 4, %v1531_v57 }
 0x127   :  { %v222_v8 = vadd.f32 %v221_v6, %v91_v1  ;;  %v223_v10 = vpop.f32.mrb[2].mxu0  ;;  %v263_v13 = vadd.f32 %v262_v9, %v99_v2  ;;  %v264_v14 = vpop.f32.mrb[2].mxu1  ;;  %v1298_v1 = vld [vmem:[#allocation8 + $0x1e0] sm:$0xff]   ;;  %v110_v2 = vsub.s32 6, %v1531_v57  ;;  %v1301_v6 = vld [vmem:[#allocation8 + $0x168] sm:$0xff]   ;;  %v1305_v57 = vld [vmem:[#allocation8 + $0x170] sm:$0xff]  }
 0x128   :  { %v349_v12 = vmul.f32 0.01, %v220_v4  ;;  %v224_v15 = vpop.f32.mrb[3].mxu0  ;;  %v351_v17 = vmul.f32 0.01, %v261_v7  ;;  %v265_v19 = vpop.f32.mrb[3].mxu1  ;;  %v103_v5 = vrot.slane %v1534_v59, %v102_v0 }
 0x129   :  { %v350_v18 = vmul.f32 0.01, %v222_v8  ;;  %v352_v21 = vmul.f32 0.01, %v263_v13  ;;  %v1299_v3 = vld [vmem:[#allocation8 + $0x120] sm:$0xff]   ;;  %v1303_v9 = vld [vmem:[#allocation8 + $0x128] sm:$0xff]  }
 0x12a   :  { %v357_v20 = vmax.f32 %v220_v4, %v349_v12  ;;  %v359_v22 = vmax.f32 %v261_v7, %v351_v17  ;;  %v1300_v4 = vld [vmem:[#allocation8 + $0x1a0] sm:$0xff]   ;;  %v111_v7 = vrot.slane %v1534_v59, %v110_v2  ;;  %v1307_v14 = vld [vmem:[#allocation8 + $0x130] sm:$0xff]   ;;  %v1309_v59 = vld [vmem:[#allocation8 + $0x178] sm:$0xff]  }
 0x12b   :  { %v358_v23 = vmax.f32 %v222_v8, %v350_v18  ;;  %v360_v25 = vmax.f32 %v263_v13, %v352_v21  ;;  %v1302_v8 = vld [vmem:[#allocation8 + $0x1e8] sm:$0xff]   ;;  %v1306_v13 = vld [vmem:[#allocation8 + $0x1f0] sm:$0xff]   ;;  %v1310_v18 = vld [vmem:[#allocation8 + $0x1f8] sm:$0xff]  }
 0x12c   :  { %v365_v30 = vpack.c.bf16 %v357_v20, %v357_v20  ;;  %v367_v36 = vpack.c.bf16 %v359_v22, %v359_v22  ;;  %v1311_v19 = vld [vmem:[#allocation8 + $0x138] sm:$0xff]  }
 0x12d   :  { %v366_v27 = vpack.c.bf16 %v358_v23, %v358_v23  ;;  %v1547_v29 = vpop.f32.mrb[4].mxu0  ;;  %v368_v31 = vpack.c.bf16 %v360_v25, %v360_v25  ;;  %v1549_v35 = vpop.f32.mrb[4].mxu1  ;;  %v1312_v21 = vld [vmem:[#allocation8 + $0x1b8] sm:$0xff]  }
 0x12e   :  { %v303_v34 = vpop.f32.mrb[5].mxu0  ;;  %v344_v40 = vpop.f32.mrb[5].mxu1  ;;  %v302_v10 = vadd.f32 %v1547_v29, %v103_v5  ;;  %v343_v12 = vadd.f32 %v1549_v35, %v111_v7 }
 0x12f   :  { %924 = vmatprep.mubr.bf16.mxu0 %v366_v27  ;;  %v304_v38 = vadd.f32 %v303_v34, %v107_v24  ;;  %v305_v39 = vpop.f32.mrb[6].mxu0  ;;  %964 = vmatprep.mubr.bf16.mxu1 %v368_v31  ;;  %v345_v42 = vadd.f32 %v344_v40, %v115_v26  ;;  %v346_v43 = vpop.f32.mrb[6].mxu1  ;;  %v1086_v27 = vld [vmem:[%s1576_s4] ss:$0 sm:$0xff]  ;;  %s1440_s4 = smov [#allocation10]  }
 0x130   :  { %925 = vmatmul.mubr.bf16.vlgmr.msra.gmra.mrb[8].mxu0 %v365_v30  ;;  %v306_v41 = vpop.f32.mrb[7].mxu0  ;;  %965 = vmatmul.mubr.bf16.vlgmr.msra.gmra.mrb[8].mxu1 %v367_v36  ;;  %v347_v46 = vpop.f32.mrb[7].mxu1  ;;  %v353_v15 = vmul.f32 0.01, %v302_v10  ;;  %v355_v17 = vmul.f32 0.01, %v343_v12 }
 0x131   :  { %1196 = vmatpush3.bf16.msra.mxu0 %v1283_v28  ;;  %v354_v45 = vmul.f32 0.01, %v304_v38  ;;  %1218 = vmatpush3.bf16.msra.mxu1 %v1284_v32  ;;  %v356_v49 = vmul.f32 0.01, %v345_v42  ;;  %s1059_s1 = sshll.u32 %s1440_s4, 4  ;;  %s1060_s1 = int_to_ptr.vmem [resolvable:$true] %s1059_s1 }
 0x132   :  { %1197 = vmatprep.subr.bf16.mxu0 %v1285_v33  ;;  %1219 = vmatprep.subr.bf16.mxu1 %v1286_v37  ;;  %v361_v20 = vmax.f32 %v302_v10, %v353_v15  ;;  %v363_v22 = vmax.f32 %v343_v12, %v355_v17  ;;  %s1401_s18 = scalar_lea.vmem %s1060_s1, 128  ;;  %p1406_p5 = scmp.lt.s32.totalorder %s1060_s1, %s1060_s1 }
 0x133   :  { %v362_v51 = vmax.f32 %v304_v38, %v354_v45  ;;  %v364_v52 = vmax.f32 %v345_v42, %v356_v49  ;;  %p1402_p4 = scmp.ne.s32.totalorder %s1060_s1, %s1401_s18  ;;  %p1407_p6 = scmp.lt.s32.totalorder %s1401_s18, %s1401_s18 }
 0x134   :  { %v369_v23 = vpack.c.bf16 %v361_v20, %v361_v20  ;;  %v371_v24 = vpack.c.bf16 %v363_v22, %v363_v22 }
 0x135   :  { %1198 = vmatpush3.bf16.msra.mxu0 %v1287_v44  ;;  %v370_v54 = vpack.c.bf16 %v362_v51, %v362_v51  ;;  %1220 = vmatpush3.bf16.msra.mxu1 %v1288_v47  ;;  %v372_v58 = vpack.c.bf16 %v364_v52, %v364_v52  ;;  %p1408_p7 = por %p1407_p6, %p1406_p5 }
 0x136   :  { %1199 = vmatprep.subr.bf16.mxu0 %v1289_v48  ;;  %1221 = vmatprep.subr.bf16.mxu1 %v1290_v50 }
 0x137   :  { %1004 = vmatprep.mubr.bf16.mxu0 %v370_v54  ;;  %1044 = vmatprep.mubr.bf16.mxu1 %v372_v58  ;;  %p1409_p8 = pnand %p1408_p7, %p1402_p4 }
 0x139   :  { %1200 = vmatpush3.bf16.msra.mxu0 %v1291_v53  ;;  %1222 = vmatpush3.bf16.msra.mxu1 %v1292_v55 }
 0x13a   :  { %1201 = vmatprep.subr.bf16.mxu0 %v1293_v56  ;;  %1223 = vmatprep.subr.bf16.mxu1 %v1294_v60 }
 0x13d   :  { %1202 = vmatpush3.bf16.msra.mxu0 %v1295_v61  ;;  %1224 = vmatpush3.bf16.msra.mxu1 %v1296_v62 }
 0x13e   :  { %1203 = vmatprep.subr.bf16.mxu0 %v1297_v63  ;;  %1225 = vmatprep.subr.bf16.mxu1 %v1298_v1 }
 0x141   :  { %1204 = vmatpush3.bf16.msra.mxu0 %v1299_v3  ;;  %1226 = vmatpush3.bf16.msra.mxu1 %v1300_v4 }
 0x142   :  { %1205 = vmatprep.subr.bf16.mxu0 %v1301_v6  ;;  %1227 = vmatprep.subr.bf16.mxu1 %v1302_v8 }
 0x145   :  { %1206 = vmatpush3.bf16.msra.mxu0 %v1303_v9  ;;  %1228 = vmatpush3.bf16.msra.mxu1 %v1304_v11 }
 0x146   :  { %1207 = vmatprep.subr.bf16.mxu0 %v1305_v57  ;;  %1229 = vmatprep.subr.bf16.mxu1 %v1306_v13 }
 0x149   :  { %1208 = vmatpush3.bf16.msra.mxu0 %v1307_v14  ;;  %1230 = vmatpush3.bf16.msra.mxu1 %v1308_v16 }
 0x14a   :  { %1209 = vmatprep.subr.bf16.mxu0 %v1309_v59  ;;  %1231 = vmatprep.subr.bf16.mxu1 %v1310_v18 }
 0x14d   :  { %1210 = vmatpush3.bf16.msra.mxu0 %v1311_v19  ;;  %1232 = vmatpush3.bf16.msra.mxu1 %v1312_v21 }
 0x150   :  { %1005 = vmatmul.mubr.bf16.vlgmr.msra.gmra.mrb[12].mxu0 %v369_v23  ;;  %1045 = vmatmul.mubr.bf16.vlgmr.msra.gmra.mrb[12].mxu1 %v371_v24 }
 0x203   :  { %v1167_v25 = vpop.f32.mrb[8].mxu0  ;;  %v1189_v26 = vpop.f32.mrb[8].mxu1 }
 0x204   :  { %v1168_v28 = vpop.f32.mrb[9].mxu0  ;;  %v1190_v30 = vpop.f32.mrb[9].mxu1 }
 0x205   :  { %v1169_v29 = vadd.f32 %v1168_v28, %v1167_v25  ;;  %v1170_v31 = vpop.f32.mrb[10].mxu0  ;;  %v1191_v32 = vadd.f32 %v1190_v30, %v1189_v26  ;;  %v1192_v33 = vpop.f32.mrb[10].mxu1 }
 0x206   :  { %v1171_v34 = vpop.f32.mrb[11].mxu0  ;;  %v1193_v36 = vpop.f32.mrb[11].mxu1 }
 0x207   :  { %v927_v35 = vadd.f32 %v1169_v29, %v1086_v27 }
 0x209   :  { %v967_v37 = vadd.f32 %v1191_v32, %v927_v35 }
 0x223   :  { %v1211_v38 = vpop.f32.mrb[12].mxu0  ;;  %v1233_v39 = vpop.f32.mrb[12].mxu1 }
 0x224   :  { %v1212_v40 = vpop.f32.mrb[13].mxu0  ;;  %v1234_v42 = vpop.f32.mrb[13].mxu1 }
 0x225   :  { %v1213_v41 = vadd.f32 %v1212_v40, %v1211_v38  ;;  %v1214_v43 = vpop.f32.mrb[14].mxu0  ;;  %v1235_v44 = vadd.f32 %v1234_v42, %v1233_v39  ;;  %v1236_v45 = vpop.f32.mrb[14].mxu1 }
 0x226   :  { %v1215_v46 = vpop.f32.mrb[15].mxu0  ;;  %v1237_v48 = vpop.f32.mrb[15].mxu1 }
 0x227   :  { %v1007_v47 = vadd.f32 %v1213_v41, %v967_v37 }
 0x229   :  { %v1047_v49 = vadd.f32 %v1235_v44, %v1007_v47 }
 0x22b   :  { %1052 = vst [vmem:[#allocation10] sm:$0xff] %v1047_v49 }
 0x22c   :  { %1412 = shalt.err (!%p1409_p8)
}
 0x22d   :  { %s1413_s21 = scalar_lea.hbm %s1577_s5, 128 }
 0x22e   :  { %p1414_p9 = scmp.ne.s32.totalorder %s1577_s5, %s1413_s21  ;;  %p1417_p10 = scmp.lt.u32.totalorder %s1413_s21, %s1577_s5 }
 0x230   :  { %p1419_p11 = pnand %p1417_p10, %p1414_p9 }
 0x232   :  { %1422 = shalt.err (!%p1419_p11)
}
 0x233   :  { %1062 = dma.vmem_to_hbm [thread:$0]  %s1060_s1, 128, %s1577_s5, [#allocation4]  }
 0x234   :  { %1429 = dma.done.wait [#allocation4], 128  }
 0x235   :  { %1430 = vsyncadd [#allocation4], 4294967168 }
 0x236   :  { %1066 = vsyncpa [#allocation3], 1 }
 0x237   :  { %1067 = vsyncpa [#allocation6], 1 }
 0x238   :  { %1068 = vsyncpa [#allocation9], 1 }
 0x239   :  { %1069 = vsyncpa [#allocation4], 1 }

</bundles_post_ra>
